<compile_context>
chip_gen: v7x
topology: tpu7x:2x2x1
jax: 0.10.0
libtpu: 0.0.40
codegen_flags: <defaults>
</compile_context>

<pallas_src>
import functools

import jax
import jax.numpy as jnp
from jax import lax
from jax.experimental import pallas as pl
from jax.experimental.pallas import tpu as pltpu
import numpy as np

N_CLASSES = 10


def _round_up(a, b):
    return (a + b - 1) // b * b


def _choose_tile(M, tile_max):
    """Lane tile: multiple of 128, as large as tile_max, but >=2 grid steps when
    there is enough work (so v7x's two TensorCores can both run)."""
    Mp = _round_up(M, 128)
    tile = min(tile_max, Mp)
    if Mp // tile >= 2:
        return tile
    if Mp >= 256:
        tile = _round_up(Mp // 2, 128)
    return tile


# ----------------------------- Pallas kernel --------------------------------

def _fused_gemm_kernel(x_ref, w_ref, b_ref, o_ref, *, n_win, cout, relu):
    """o = act(max_win(W @ x_win) + b), all pool windows via ONE block-diag matmul.

    x: (n_win*K, tile)        streamed patches, window-major rows (bf16 / f32)
    w: (n_win*cout, n_win*K)  block-diagonal window-fused weights
    b: (cout, 1)              bias (f32)
    o: (cout, tile)           lane-dense output block
    """
    acc = jnp.dot(w_ref[...], x_ref[...], preferred_element_type=jnp.float32)
    if n_win > 1:
        # Max over the four sublane-aligned Cout row groups (pure VPU).
        m = acc[:cout]
        for wi in range(1, n_win):
            m = jnp.maximum(m, acc[wi * cout:(wi + 1) * cout])
        acc = m
    acc = acc + b_ref[...]
    if relu:
        acc = jnp.maximum(acc, 0.0)
    o_ref[...] = acc.astype(o_ref.dtype)


def fused_gemm_max_bias_act(x_flat, w_fused, b2d, *, n_win, cout, relu,
                            out_dtype=jnp.float32, tile_max=1024):
    """x_flat: (n_win*K, M), w_fused: (n_win*cout, n_win*K), b2d: (cout,1) -> (cout, M)."""
    KW, M = x_flat.shape
    assert w_fused.shape == (n_win * cout, KW)

    tile = _choose_tile(M, tile_max)
    Mp = _round_up(M, tile)
    if Mp != M:
        x_flat = jnp.pad(x_flat, ((0, 0), (0, Mp - M)))
    grid = (Mp // tile,)

    kernel = functools.partial(_fused_gemm_kernel, n_win=n_win, cout=cout, relu=relu)
    cost = pl.CostEstimate(
        flops=2 * (n_win * cout) * KW * Mp + 2 * cout * Mp,
        transcendentals=0,
        bytes_accessed=int(x_flat.dtype.itemsize) * KW * Mp
                       + int(w_fused.dtype.itemsize) * int(w_fused.size)
                       + 4 * cout + 4 * cout * Mp,
    )
    out = pl.pallas_call(
        kernel,
        out_shape=jax.ShapeDtypeStruct((cout, Mp), out_dtype),
        grid=grid,
        in_specs=[
            pl.BlockSpec((KW, tile), lambda i: (0, i)),
            pl.BlockSpec((n_win * cout, KW), lambda i: (0, 0)),
            pl.BlockSpec((cout, 1), lambda i: (0, 0)),
        ],
        out_specs=pl.BlockSpec((cout, tile), lambda i: (0, i)),
        compiler_params=pltpu.CompilerParams(
            dimension_semantics=("parallel",)),
        cost_estimate=cost,
    )(x_flat, w_fused, b2d)
    if Mp != M:
        out = out[:, :M]
    return out


# ------------------------------- JAX glue ------------------------------------

def im2col_T_poolgrouped(x_nhwc, k=3, pad=1):
    """(N,H,W,C) with even H,W -> (4*k*k*C, N*(H//2)*(W//2)).

    rows: window-major — row = win*K + feature, win = dy*2+dx, feature = (ky,kx,cin)
    cols: pooled output pixel, order (n, yo, xo)
    """
    N, H, W, C = x_nhwc.shape
    Ho, Wo = H // 2, W // 2
    K = k * k * C
    xp = jnp.pad(x_nhwc, ((0, 0), (pad, pad), (pad, pad), (0, 0)))
    cols = [xp[:, ky:ky + H, kx:kx + W, :] for ky in range(k) for kx in range(k)]
    p = jnp.stack(cols, axis=0)                  # (9, N, H, W, C)
    p = jnp.transpose(p, (0, 4, 1, 2, 3))        # (9, C, N, H, W)
    p = p.reshape(K, N, Ho, 2, Wo, 2)            # split spatial into pool windows
    p = jnp.transpose(p, (3, 5, 0, 1, 2, 4))     # (dy, dx, K, N, Ho, Wo)
    return p.reshape(4 * K, N * Ho * Wo)


def conv_weight_to_2d(w_oihw):
    """torch (Cout, Cin, Kh, Kw) -> (Cout, Kh*Kw*Cin), feature order (ky, kx, cin)."""
    cout, cin, kh, kw = w_oihw.shape
    return jnp.transpose(w_oihw, (0, 2, 3, 1)).reshape(cout, kh * kw * cin)


def window_fused_weight(w2d, n_win, dtype):
    """(Cout, K) -> block-diagonal (n_win*Cout, n_win*K): window w's rows use window w's cols."""
    return jnp.kron(jnp.eye(n_win, dtype=dtype), w2d.astype(dtype))


def cnn_forward(x_nchw, params):
    """Matches PyTorch CNN.forward (x is NCHW, 28x28 spatial)."""
    w1, b1, w2, b2, wf, bf = params
    N = x_nchw.shape[0]
    c1 = w1.shape[0]                                              # 8
    c2 = w2.shape[0]                                              # 16

    x = jnp.transpose(x_nchw, (0, 2, 3, 1)).astype(jnp.bfloat16)  # NHWC, bf16 stream

    # conv1 (3x3, pad 1) + relu + 2x2 maxpool, one fused kernel; h1 kept in bf16.
    p1 = im2col_T_poolgrouped(x)                                  # (36*Cin, N*196) bf16
    w1f = window_fused_weight(conv_weight_to_2d(w1), 4, jnp.bfloat16)
    h1 = fused_gemm_max_bias_act(p1, w1f, b1.reshape(-1, 1),
                                 n_win=4, cout=c1, relu=True,
                                 out_dtype=jnp.bfloat16)          # (8, N*196)
    h1 = jnp.transpose(h1.reshape(c1, N, 14, 14), (1, 2, 3, 0))   # (N,14,14,8) bf16

    # conv2 (3x3, pad 1) + relu + 2x2 maxpool, one fused kernel; f32 out for fc.
    p2 = im2col_T_poolgrouped(h1)                                 # (288, N*49) bf16
    w2f = window_fused_weight(conv_weight_to_2d(w2), 4, jnp.bfloat16)
    h2 = fused_gemm_max_bias_act(p2, w2f, b2.reshape(-1, 1),
                                 n_win=4, cout=c2, relu=True)     # (16, N*49) f32

    # fc: PyTorch flattens NCHW, i.e. feature order (c, y, x) — exactly the native
    # channel-major layout of h2, so no NHWC->NCHW transpose is needed.
    # TODO(synk): fuse the fc GEMM into conv2's epilogue to skip this round trip.
    hf = jnp.transpose(h2.reshape(c2, N, 49), (0, 2, 1)).reshape(c2 * 49, N)
    out_t = fused_gemm_max_bias_act(hf, wf, bf.reshape(-1, 1),
                                    n_win=1, cout=N_CLASSES, relu=False)  # (10, N)
    return out_t.T                                                # (N, 10)


# ----------------------- pure-JAX reference (for check) ----------------------

def ref_forward(x, params):
    w1, b1, w2, b2, wf, bf = params
    dn = ("NCHW", "OIHW", "NCHW")

    def conv(x, w, b):
        y = lax.conv_general_dilated(x, w, (1, 1), ((1, 1), (1, 1)),
                                     dimension_numbers=dn)
        return jax.nn.relu(y + b[None, :, None, None])

    def pool(x):
        return lax.reduce_window(x, -jnp.inf, lax.max,
                                 (1, 1, 2, 2), (1, 1, 2, 2), "VALID")

    y = pool(conv(x, w1, b1))
    y = pool(conv(y, w2, b2))
    y = y.reshape(y.shape[0], -1)
    return y @ wf.T + bf


# --------------------------------- params ------------------------------------

def init_params(key, n_channels, n_classes):
    ks = jax.random.split(key, 6)

    def uinit(k, shape, fan_in):
        bound = 1.0 / np.sqrt(fan_in)
        return jax.random.uniform(k, shape, jnp.float32, -bound, bound)

    w1 = uinit(ks[0], (8, n_channels, 3, 3), n_channels * 9)
    b1 = uinit(ks[1], (8,), n_channels * 9)
    w2 = uinit(ks[2], (16, 8, 3, 3), 8 * 9)
    b2 = uinit(ks[3], (16,), 8 * 9)
    wf = uinit(ks[4], (n_classes, 16 * 7 * 7), 16 * 7 * 7)
    bf = uinit(ks[5], (n_classes,), 16 * 7 * 7)
    return (w1, b1, w2, b2, wf, bf)


if __name__ == "__main__":
    key = jax.random.PRNGKey(0)
    k_x, k_p = jax.random.split(key)

    n_channels = 1
    batch = 2
    # fc1 expects 16*7*7 => input spatial must be 28x28 (two 2x2 pools).
    x = jax.random.normal(k_x, (batch, n_channels, 28, 28), jnp.float32)
    params = init_params(k_p, n_channels, N_CLASSES)

    fwd = jax.jit(cnn_forward)
    out = jax.block_until_ready(fwd(x, params))
    assert out.shape == (batch, N_CLASSES), out.shape

    ref = jax.block_until_ready(ref_forward(x, params))
    # bf16 streaming operands in the conv GEMMs (f32 accumulation) -> looser tolerance.
    np.testing.assert_allclose(np.asarray(out, dtype=np.float32), np.asarray(ref),
                               rtol=3e-2, atol=3e-2)

    print("KERNEL_OK")
</pallas_src>

<mosaic_0001>
module attributes {stable_mosaic.version = 11 : i64} {
  func.func @_fused_gemm_kernel(%arg0: i32, %arg1: memref<36x256xbf16, #tpu.memory_space<vmem>>, %arg2: memref<32x36xbf16, #tpu.memory_space<vmem>>, %arg3: memref<8x1xf32, #tpu.memory_space<vmem>>, %arg4: memref<8x256xbf16, #tpu.memory_space<vmem>>) attributes {dimension_semantics = [#tpu.dimension_semantics<parallel>], iteration_bounds = array<i64: 2>, scalar_prefetch = 0 : i64, scratch_operands = 0 : i64, tpu.core_type = #tpu.core_type<tc>, window_params = [{transform_indices = @transform_0, window_bounds = array<i64: 36, 256>}, {pipeline_mode = #tpu.pipeline_mode<synchronous>, transform_indices = @transform_1, window_bounds = array<i64: 32, 36>}, {pipeline_mode = #tpu.pipeline_mode<synchronous>, transform_indices = @transform_2, window_bounds = array<i64: 8, 1>}, {transform_indices = @transform_3, window_bounds = array<i64: 8, 256>}]} {
    %c0 = arith.constant 0 : index
    %c0_0 = arith.constant 0 : index
    %0 = vector.load %arg2[%c0, %c0_0] : memref<32x36xbf16, #tpu.memory_space<vmem>>, vector<32x36xbf16>
    %c0_1 = arith.constant 0 : index
    %c0_2 = arith.constant 0 : index
    %1 = vector.load %arg1[%c0_1, %c0_2] : memref<36x256xbf16, #tpu.memory_space<vmem>>, vector<36x256xbf16>
    %cst = arith.constant dense<0.000000e+00> : vector<32x256xf32>
    %2 = tpu.matmul %0, %1, %cst {dimension_numbers = #tpu.dot_dimension_numbers<[1], [0], [0], [1], [0, 0, 1, 1], [], []>} : vector<32x36xbf16>, vector<36x256xbf16>, vector<32x256xf32> -> vector<32x256xf32>
    %3 = vector.extract_strided_slice %2 {offsets = [0, 0], sizes = [8, 256], strides = [1, 1]} : vector<32x256xf32> to vector<8x256xf32>
    %4 = vector.extract_strided_slice %2 {offsets = [8, 0], sizes = [8, 256], strides = [1, 1]} : vector<32x256xf32> to vector<8x256xf32>
    %5 = arith.maximumf %3, %4 : vector<8x256xf32>
    %6 = vector.extract_strided_slice %2 {offsets = [16, 0], sizes = [8, 256], strides = [1, 1]} : vector<32x256xf32> to vector<8x256xf32>
    %7 = arith.maximumf %5, %6 : vector<8x256xf32>
    %8 = vector.extract_strided_slice %2 {offsets = [24, 0], sizes = [8, 256], strides = [1, 1]} : vector<32x256xf32> to vector<8x256xf32>
    %9 = arith.maximumf %7, %8 : vector<8x256xf32>
    %c0_3 = arith.constant 0 : index
    %c0_4 = arith.constant 0 : index
    %10 = vector.load %arg3[%c0_3, %c0_4] : memref<8x1xf32, #tpu.memory_space<vmem>>, vector<8x1xf32>
    %11 = vector.broadcast %10 : vector<8x1xf32> to vector<8x256xf32>
    %12 = arith.addf %9, %11 : vector<8x256xf32>
    %cst_5 = arith.constant 0.000000e+00 : f32
    %13 = vector.broadcast %cst_5 : f32 to vector<8x256xf32>
    %14 = arith.maximumf %12, %13 : vector<8x256xf32>
    %15 = arith.truncf %14 : vector<8x256xf32> to vector<8x256xbf16>
    %c0_6 = arith.constant 0 : index
    %c0_7 = arith.constant 0 : index
    %16 = vector.load %arg4[%c0_6, %c0_7] : memref<8x256xbf16, #tpu.memory_space<vmem>>, vector<8x256xbf16>
    tpu.vector_store %arg4[%c0_6, %c0_7], %15 {strides = array<i32>} : memref<8x256xbf16, #tpu.memory_space<vmem>>, vector<8x256xbf16>,
    return
  }
  func.func @transform_0(%arg0: i32) -> (i32, i32) {
    %c0_i32 = arith.constant 0 : i32
    %c0_i32_0 = arith.constant 0 : i32
    return %c0_i32, %arg0 : i32, i32
  }
  func.func @transform_1(%arg0: i32) -> (i32, i32) {
    %c0_i32 = arith.constant 0 : i32
    %c0_i32_0 = arith.constant 0 : i32
    %c0_i32_1 = arith.constant 0 : i32
    return %c0_i32, %c0_i32_0 : i32, i32
  }
  func.func @transform_2(%arg0: i32) -> (i32, i32) {
    %c0_i32 = arith.constant 0 : i32
    %c0_i32_0 = arith.constant 0 : i32
    %c0_i32_1 = arith.constant 0 : i32
    return %c0_i32, %c0_i32_0 : i32, i32
  }
  func.func @transform_3(%arg0: i32) -> (i32, i32) {
    %c0_i32 = arith.constant 0 : i32
    %c0_i32_0 = arith.constant 0 : i32
    return %c0_i32, %arg0 : i32, i32
  }
}

module attributes {stable_mosaic.version = 11 : i64} {
  func.func @_fused_gemm_kernel(%arg0: i32, %arg1: memref<288x128xbf16, #tpu.memory_space<vmem>>, %arg2: memref<64x288xbf16, #tpu.memory_space<vmem>>, %arg3: memref<16x1xf32, #tpu.memory_space<vmem>>, %arg4: memref<16x128xf32, #tpu.memory_space<vmem>>) attributes {dimension_semantics = [#tpu.dimension_semantics<parallel>], iteration_bounds = array<i64: 1>, scalar_prefetch = 0 : i64, scratch_operands = 0 : i64, tpu.core_type = #tpu.core_type<tc>, window_params = [{transform_indices = @transform_0, window_bounds = array<i64: 288, 128>}, {pipeline_mode = #tpu.pipeline_mode<synchronous>, transform_indices = @transform_1, window_bounds = array<i64: 64, 288>}, {pipeline_mode = #tpu.pipeline_mode<synchronous>, transform_indices = @transform_2, window_bounds = array<i64: 16, 1>}, {transform_indices = @transform_3, window_bounds = array<i64: 16, 128>}]} {
    %c0 = arith.constant 0 : index
    %c0_0 = arith.constant 0 : index
    %0 = vector.load %arg2[%c0, %c0_0] : memref<64x288xbf16, #tpu.memory_space<vmem>>, vector<64x288xbf16>
    %c0_1 = arith.constant 0 : index
    %c0_2 = arith.constant 0 : index
    %1 = vector.load %arg1[%c0_1, %c0_2] : memref<288x128xbf16, #tpu.memory_space<vmem>>, vector<288x128xbf16>
    %cst = arith.constant dense<0.000000e+00> : vector<64x128xf32>
    %2 = tpu.matmul %0, %1, %cst {dimension_numbers = #tpu.dot_dimension_numbers<[1], [0], [0], [1], [0, 0, 1, 1], [], []>} : vector<64x288xbf16>, vector<288x128xbf16>, vector<64x128xf32> -> vector<64x128xf32>
    %3 = vector.extract_strided_slice %2 {offsets = [0, 0], sizes = [16, 128], strides = [1, 1]} : vector<64x128xf32> to vector<16x128xf32>
    %4 = vector.extract_strided_slice %2 {offsets = [16, 0], sizes = [16, 128], strides = [1, 1]} : vector<64x128xf32> to vector<16x128xf32>
    %5 = arith.maximumf %3, %4 : vector<16x128xf32>
    %6 = vector.extract_strided_slice %2 {offsets = [32, 0], sizes = [16, 128], strides = [1, 1]} : vector<64x128xf32> to vector<16x128xf32>
    %7 = arith.maximumf %5, %6 : vector<16x128xf32>
    %8 = vector.extract_strided_slice %2 {offsets = [48, 0], sizes = [16, 128], strides = [1, 1]} : vector<64x128xf32> to vector<16x128xf32>
    %9 = arith.maximumf %7, %8 : vector<16x128xf32>
    %c0_3 = arith.constant 0 : index
    %c0_4 = arith.constant 0 : index
    %10 = vector.load %arg3[%c0_3, %c0_4] : memref<16x1xf32, #tpu.memory_space<vmem>>, vector<16x1xf32>
    %11 = vector.broadcast %10 : vector<16x1xf32> to vector<16x128xf32>
    %12 = arith.addf %9, %11 : vector<16x128xf32>
    %cst_5 = arith.constant 0.000000e+00 : f32
    %13 = vector.broadcast %cst_5 : f32 to vector<16x128xf32>
    %14 = arith.maximumf %12, %13 : vector<16x128xf32>
    %c0_6 = arith.constant 0 : index
    %c0_7 = arith.constant 0 : index
    %15 = vector.load %arg4[%c0_6, %c0_7] : memref<16x128xf32, #tpu.memory_space<vmem>>, vector<16x128xf32>
    tpu.vector_store %arg4[%c0_6, %c0_7], %14 {strides = array<i32>} : memref<16x128xf32, #tpu.memory_space<vmem>>, vector<16x128xf32>,
    return
  }
  func.func @transform_0(%arg0: i32) -> (i32, i32) {
    %c0_i32 = arith.constant 0 : i32
    %c0_i32_0 = arith.constant 0 : i32
    return %c0_i32, %arg0 : i32, i32
  }
  func.func @transform_1(%arg0: i32) -> (i32, i32) {
    %c0_i32 = arith.constant 0 : i32
    %c0_i32_0 = arith.constant 0 : i32
    %c0_i32_1 = arith.constant 0 : i32
    return %c0_i32, %c0_i32_0 : i32, i32
  }
  func.func @transform_2(%arg0: i32) -> (i32, i32) {
    %c0_i32 = arith.constant 0 : i32
    %c0_i32_0 = arith.constant 0 : i32
    %c0_i32_1 = arith.constant 0 : i32
    return %c0_i32, %c0_i32_0 : i32, i32
  }
  func.func @transform_3(%arg0: i32) -> (i32, i32) {
    %c0_i32 = arith.constant 0 : i32
    %c0_i32_0 = arith.constant 0 : i32
    return %c0_i32, %arg0 : i32, i32
  }
}

module attributes {stable_mosaic.version = 11 : i64} {
  func.func @_fused_gemm_kernel(%arg0: i32, %arg1: memref<784x128xf32, #tpu.memory_space<vmem>>, %arg2: memref<10x784xf32, #tpu.memory_space<vmem>>, %arg3: memref<10x1xf32, #tpu.memory_space<vmem>>, %arg4: memref<10x128xf32, #tpu.memory_space<vmem>>) attributes {dimension_semantics = [#tpu.dimension_semantics<parallel>], iteration_bounds = array<i64: 1>, scalar_prefetch = 0 : i64, scratch_operands = 0 : i64, tpu.core_type = #tpu.core_type<tc>, window_params = [{transform_indices = @transform_0, window_bounds = array<i64: 784, 128>}, {pipeline_mode = #tpu.pipeline_mode<synchronous>, transform_indices = @transform_1, window_bounds = array<i64: 10, 784>}, {pipeline_mode = #tpu.pipeline_mode<synchronous>, transform_indices = @transform_2, window_bounds = array<i64: 10, 1>}, {transform_indices = @transform_3, window_bounds = array<i64: 10, 128>}]} {
    %c0 = arith.constant 0 : index
    %c0_0 = arith.constant 0 : index
    %0 = vector.load %arg2[%c0, %c0_0] : memref<10x784xf32, #tpu.memory_space<vmem>>, vector<10x784xf32>
    %c0_1 = arith.constant 0 : index
    %c0_2 = arith.constant 0 : index
    %1 = vector.load %arg1[%c0_1, %c0_2] : memref<784x128xf32, #tpu.memory_space<vmem>>, vector<784x128xf32>
    %cst = arith.constant dense<0.000000e+00> : vector<10x128xf32>
    %2 = tpu.matmul %0, %1, %cst {dimension_numbers = #tpu.dot_dimension_numbers<[1], [0], [0], [1], [0, 0, 1, 1], [], []>} : vector<10x784xf32>, vector<784x128xf32>, vector<10x128xf32> -> vector<10x128xf32>
    %c0_3 = arith.constant 0 : index
    %c0_4 = arith.constant 0 : index
    %3 = vector.load %arg3[%c0_3, %c0_4] : memref<10x1xf32, #tpu.memory_space<vmem>>, vector<10x1xf32>
    %4 = vector.broadcast %3 : vector<10x1xf32> to vector<10x128xf32>
    %5 = arith.addf %2, %4 : vector<10x128xf32>
    %c0_5 = arith.constant 0 : index
    %c0_6 = arith.constant 0 : index
    %6 = vector.load %arg4[%c0_5, %c0_6] : memref<10x128xf32, #tpu.memory_space<vmem>>, vector<10x128xf32>
    tpu.vector_store %arg4[%c0_5, %c0_6], %5 {strides = array<i32>} : memref<10x128xf32, #tpu.memory_space<vmem>>, vector<10x128xf32>,
    return
  }
  func.func @transform_0(%arg0: i32) -> (i32, i32) {
    %c0_i32 = arith.constant 0 : i32
    %c0_i32_0 = arith.constant 0 : i32
    return %c0_i32, %arg0 : i32, i32
  }
  func.func @transform_1(%arg0: i32) -> (i32, i32) {
    %c0_i32 = arith.constant 0 : i32
    %c0_i32_0 = arith.constant 0 : i32
    %c0_i32_1 = arith.constant 0 : i32
    return %c0_i32, %c0_i32_0 : i32, i32
  }
  func.func @transform_2(%arg0: i32) -> (i32, i32) {
    %c0_i32 = arith.constant 0 : i32
    %c0_i32_0 = arith.constant 0 : i32
    %c0_i32_1 = arith.constant 0 : i32
    return %c0_i32, %c0_i32_0 : i32, i32
  }
  func.func @transform_3(%arg0: i32) -> (i32, i32) {
    %c0_i32 = arith.constant 0 : i32
    %c0_i32_0 = arith.constant 0 : i32
    return %c0_i32, %arg0 : i32, i32
  }
}

</mosaic_0001>

<bundles_post_ra>
// kernel: cnn_forward.3
= control target key start
LH: loop header
LB: loop body
LE: loop exit
PB: predicated region body
PF: predicated region fallthrough
CT: control target
= control target key end

     0   :  { %s537_s12 = smov 0   ;;  %s539_s13 = smov 0   ;;  %s598_s0 = inlined_call_operand.vmem [shape: bf16[36,512], index: 0, kind: input, shape index: {}]   ;;  %s599_s1 = inlined_call_operand.vmem [shape: bf16[32,36], index: 1, kind: input, shape index: {}]   ;;  %s600_s2 = inlined_call_operand.vmem [shape: f32[8,1], index: 2, kind: input, shape index: {}]   ;;  %s601_s3 = inlined_call_operand.vmem [shape: bf16[8,512], index: 3, kind: output, shape index: {}]  }
   0x1   :  { %s541_s14 = smov 0  }
   0x2 LB: > { %s423_s15 = sadd.s32 4294967295, %s514_s14   ;;  %s554_s16 = sadd.s32 1, %s514_s14   ;;  %s514_s14 = sphi %s541_s14, %s604_s14   ;;  %s510_s13 = sphi %s539_s13, %s603_s13   ;;  %s506_s12 = sphi %s537_s12, %s602_s12  }
   0x3   : > { %s17_s17 = ssub.s32 %s514_s14, %s554_s16  ;;  %s20_s18 = sadd.s32 1, %s510_s13 }
   0x4   : > { %p18_p0 = scmp.eq.s32.totalorder %s17_s17, 0  ;;  %p27_p1 = scmp.ne.s32.totalorder %s510_s13, %s506_s12 }
   0x5   : > { %p28_p2 = scmp.eq.s32.totalorder %s514_s14, 0  ;;  %p426_p4 = scmp.ge.s32.totalorder %s514_s14, 2 }
   0x6   : > { %s563_s19 = scalar_select %p18_p0, %s510_s13, %s20_s18  }
   0x7   : > { %p29_p3 = por %p28_p2, %p27_p1  ;;  %127 = sbr.rel (%p426_p4) target bundleno = 21 (0x15), region = 24 }
   0xe   : > { %130 = sbr.rel (!%p29_p3) target bundleno = 21 (0x15), region = 28  ;;  %s132_s20 = sand.u32 (%p29_p3), 1, %s510_s13  }
   0xf   : > { %s446_s21 = sshll.u32 (%p29_p3), %s514_s14, 3  ;;  %s454_s22 = smul.u32 (%p29_p3), 40, %s132_s20 }
  0x10   : > { %s137_s25 = scalar_lea.vmem (%p29_p3), %s598_s0, %s446_s21 }
  0x11   : > { %v173_v0 = vld [vmem:[%s137_s25] sm:$0xff] (%p29_p3)  ;;  %v175_v1 = vld [vmem:[%s137_s25 + $0x10] sm:$0xff] (%p29_p3)  ;;  %s134_s26 = scalar_lea.vmem (%p29_p3), [#allocation2], %s454_s22 }
  0x12   : > { %v177_v2 = vld [vmem:[%s137_s25 + $0x20] sm:$0xff] (%p29_p3)  ;;  %v179_v3 = vld [vmem:[%s137_s25 + $0x30] sm:$0xff] (%p29_p3)  ;;  %174 = vst [vmem:[%s134_s26] sm:$0xff] (%p29_p3), %v173_v0  ;;  %176 = vst [vmem:[%s134_s26 + $0x8] sm:$0xff] (%p29_p3), %v175_v1 }
  0x13   : > { %v181_v4 = vld [vmem:[%s137_s25 + $0x40] sm:$0xff] (%p29_p3)  ;;  %178 = vst [vmem:[%s134_s26 + $0x10] sm:$0xff] (%p29_p3), %v177_v2  ;;  %180 = vst [vmem:[%s134_s26 + $0x18] sm:$0xff] (%p29_p3), %v179_v3 }
  0x14   : > { %182 = vst [vmem:[%s134_s26 + $0x20] sm:$0xff] (%p29_p3), %v181_v4 }
  0x15 PF: > { %p429_p5 = scmp.ge.s32.totalorder %s514_s14, 1  ;;  %p187_p6 = scmp.lt.s32.totalorder %s514_s14, 3 }
  0x17   : > { %p188_p7 = pnand %p429_p5, %p187_p6 }
  0x18   : > { %s194_s27 = sand.u32 (!%p188_p7), 1, %s506_s12   ;;  %v516_v5 = vmov (!%p188_p7), 0   ;;  %v342_v6 = vld [vmem:[%s600_s2] sm:$0xff] (!%p188_p7)  ;;  %vm276_vm0 = vcmask (!%p188_p7), 1041408   ;;  %v491_v16 = vld [vmem:[%s599_s1 + $0x8] sm:$0xff] (!%p188_p7)   ;;  %vm269_vm1 = vcmask (!%p188_p7), 293888  }
  0x19   : > { %191 = sbr.rel (%p188_p7) target bundleno = 270 (0x10e), region = 66  ;;  %315 = vmatprep.mubr.bf16.mxu0 (!%p188_p7), %v516_v5  ;;  %325 = vmatprep.mubr.bf16.mxu1 (!%p188_p7), %v516_v5  ;;  %v490_v15 = vld [vmem:[%s599_s1] sm:$0xff] (!%p188_p7)   ;;  %s430_s9 = sshll.u32 (!%p188_p7), %s423_s15, 1 }
  0x1a   : > { %s455_s28 = smul.u32 (!%p188_p7), 40, %s194_s27  ;;  %481 = vset.pattern.permute.xlu0 (!%p188_p7), %v516_v5  ;;  %p219_p8 = scmp.lt.s32.totalorder (!%p188_p7), %s430_s9, 3 }
  0x1b   : > { %345 = vperm.xlu0 (!%p188_p7), %481, %v342_v6  }
  0x1c   : > { %s196_s4 = scalar_lea.vmem (!%p188_p7), [#allocation2], %s455_s28 }
  0x1d   : > { %v482_v7 = vld [vmem:[%s196_s4 + $0x4] ss:$8 sps:$4 sm:$0xff] (!%p188_p7)   ;;  %v484_v8 = vld [vmem:[%s196_s4] ss:$8 sps:$4 sm:$0xff] (!%p188_p7)   ;;  %v485_v9 = vld [vmem:[%s196_s4 + $0x14] ss:$8 sps:$4 sm:$0xff] (!%p188_p7)  }
  0x1e   : > { %283 = vmatprep.subr.bf16.mxu0 (!%p188_p7), %v482_v7  ;;  %448 = vmatprep.subr.bf16.mxu1 (!%p188_p7), %v482_v7  ;;  %v233_v10 = vld [vmem:[%s196_s4 + $0x20] sm:$0x33] (!%p188_p7)  ;;  %v487_v11 = vld [vmem:[%s196_s4 + $0x10] ss:$8 sps:$4 sm:$0xff] (!%p188_p7)  }
  0x1f   : > { %284 = vmatpush1.bf16.msra.mxu0 (!%p188_p7), %v484_v8  ;;  %451 = vmatpush1.bf16.msra.mxu1 (!%p188_p7), %v484_v8  ;;  %v439_v12 = vcombine.high (!%p188_p7), %v233_v10, %v233_v10  ;;  %v438_v13 = vcombine.low (!%p188_p7), %v233_v10, %v233_v10 }
  0x20   : > { %285 = vmatprep.subr.bf16.mxu0 %v485_v9  ;;  %449 = vmatprep.subr.bf16.mxu1 %v485_v9  ;;  %s606_s9 = smov (!%p219_p8, %s430_s9), 3 }
  0x21   : > { %v278_v14 = vsel %vm276_vm0, %v438_v13, 0  ;;  %s431_s10 = sshll.u32 %s606_s9, 2 }
  0x22   : > { %s222_s14 = scalar_lea.vmem %s601_s3, %s431_s10 }
  0x23   : > { %286 = vmatpush1.bf16.msra.mxu0 %v487_v11  ;;  %452 = vmatpush1.bf16.msra.mxu1 %v487_v11 }
  0x24   : > { %440 = vmatprep.subr.msk.bf16.mxu0 %vm276_vm0, %v439_v12  ;;  %450 = vmatprep.subr.msk.bf16.mxu1 %vm276_vm0, %v439_v12 }
  0x27   : > { %288 = vmatpush1.bf16.msra.mxu0 %v278_v14  ;;  %453 = vmatpush1.bf16.msra.mxu1 %v278_v14 }
  0x2a   : > { %441 = vmatmul.mubr.msk.bf16.vlgmr.msra.gmra.mrb[0].mxu0 %vm269_vm1, %v490_v15  ;;  %442 = vmatmul.mubr.msk.bf16.vlgmr.msra.gmra.mrb[0].mxu1 %vm269_vm1, %v491_v16 }
  0x9a   : > { %v346_v29 = vpop.permute.xlu0 %345 }
  0xfd   : > { %v317_v17 = vpop.f32.mrb[0].mxu0  ;;  %v327_v18 = vpop.f32.mrb[0].mxu1 }
  0xfe   : > { %v319_v19 = vpop.f32.mrb[1].mxu0  ;;  %v329_v20 = vpop.f32.mrb[1].mxu1 }
  0xff   : > { %v321_v21 = vpop.f32.mrb[2].mxu0  ;;  %v331_v22 = vpop.f32.mrb[2].mxu1 }
 0x100   : > { %v336_v23 = vmax.f32 %v317_v17, %v321_v21  ;;  %v323_v24 = vpop.f32.mrb[3].mxu0  ;;  %v333_v25 = vpop.f32.mrb[3].mxu1 }
 0x101   : > { %v337_v26 = vmax.f32 %v319_v19, %v323_v24 }
 0x102   : > { %v338_v27 = vmax.f32 %v336_v23, %v327_v18 }
 0x103   : > { %v339_v28 = vmax.f32 %v337_v26, %v329_v20 }
 0x104   : > { %v340_v30 = vmax.f32 %v338_v27, %v331_v22 }
 0x105   : > { %v341_v31 = vmax.f32 %v339_v28, %v333_v25 }
 0x106   : > { %v348_v32 = vadd.f32 %v346_v29, %v340_v30 }
 0x107   : > { %v349_v33 = vadd.f32 %v346_v29, %v341_v31 }
 0x108   : > { %v350_v34 = vmax.f32 %v348_v32, 0.0 }
 0x109   : > { %v351_v35 = vmax.f32 %v349_v33, 0.0 }
 0x10b   : > { %v447_v36 = vpack.c.bf16 %v351_v35, %v350_v34 }
 0x10d   : > { %360 = vst [vmem:[%s222_s14] sm:$0xff] %v447_v36 }
 0x10e PF: > { %p10_p9 = scmp.ge.s32.totalorder %s554_s16, 4   ;;  %s602_s12 = smov %s510_s13 }
 0x10f   : > { %s603_s13 = smov %s563_s19  ;;  %s604_s14 = smov %s554_s16 }
 0x110   :  { %12 = sbr.rel (!%p10_p9) target bundleno = 2 (0x2), region = 105 }

// kernel: cnn_forward.4
= control target key start
LH: loop header
LB: loop body
LE: loop exit
PB: predicated region body
PF: predicated region fallthrough
CT: control target
= control target key end

     0   :  { %v550_v1 = vmov 0   ;;  %vm235_vm0 = vcmask 261120   ;;  %s677_s0 = inlined_call_operand.vmem [shape: bf16[288,128], index: 0, kind: input, shape index: {}]   ;;  %s678_s1 = inlined_call_operand.vmem [shape: bf16[64,288], index: 1, kind: input, shape index: {}]   ;;  %s679_s2 = inlined_call_operand.vmem [shape: f32[16,1], index: 2, kind: input, shape index: {}]   ;;  %s680_s3 = inlined_call_operand.vmem [shape: f32[16,128], index: 3, kind: output, shape index: {}]  }
   0x1   :  { %v516_v0 = vld [vmem:[%s677_s0 + $0x40] sm:$0xff]   ;;  %515 = vset.pattern.permute.xlu0 %v550_v1  ;;  %v518_v3 = vld [vmem:[%s677_s0 + $0x48] sm:$0xff]   ;;  %v520_v5 = vld [vmem:[%s677_s0 + $0x50] sm:$0xff]  }
   0x2   :  { %v517_v2 = vld [vmem:[%s677_s0] sm:$0xff]   ;;  %440 = vmatprep.subr.bf16.mxu0 %v516_v0  ;;  %498 = vmatprep.subr.bf16.mxu1 %v516_v0  ;;  %v519_v4 = vld [vmem:[%s677_s0 + $0x8] sm:$0xff]   ;;  %v521_v6 = vld [vmem:[%s677_s0 + $0x10] sm:$0xff]  }
   0x3   :  { %441 = vmatpush3.bf16.msra.mxu0 %v517_v2  ;;  %506 = vmatpush3.bf16.msra.mxu1 %v517_v2  ;;  %v522_v7 = vld [vmem:[%s677_s0 + $0x58] sm:$0xff]   ;;  %v524_v9 = vld [vmem:[%s677_s0 + $0x60] sm:$0xff]   ;;  %v526_v11 = vld [vmem:[%s677_s0 + $0x68] sm:$0xff]  }
   0x4   :  { %442 = vmatprep.subr.bf16.mxu0 %v518_v3  ;;  %499 = vmatprep.subr.bf16.mxu1 %v518_v3  ;;  %v523_v8 = vld [vmem:[%s677_s0 + $0x18] sm:$0xff]   ;;  %v525_v10 = vld [vmem:[%s677_s0 + $0x20] sm:$0xff]   ;;  %v527_v14 = vld [vmem:[%s677_s0 + $0x28] sm:$0xff]  }
   0x5   :  { %v534_v12 = vld [vmem:[%s678_s1 + $0x4] ss:$12 sps:$4 sm:$0xff]   ;;  %v537_v13 = vld [vmem:[%s678_s1 + $0x4c] ss:$12 sps:$4 sm:$0xff]   ;;  %v535_v22 = vld [vmem:[%s678_s1 + $0x48] ss:$12 sps:$4 sm:$0xff]  }
   0x6   :  { %v528_v15 = vld [vmem:[%s677_s0 + $0x70] sm:$0xff]   ;;  %280 = vmatprep.mubr.bf16.mxu0 %v534_v12  ;;  %304 = vmatprep.mubr.bf16.mxu1 %v537_v13  ;;  %v530_v17 = vld [vmem:[%s677_s0 + $0x78] sm:$0xff]   ;;  %v384_v19 = vld [vmem:[%s679_s2] sm:$0xff] }
   0x7   :  { %443 = vmatpush3.bf16.msra.mxu0 %v519_v4  ;;  %507 = vmatpush3.bf16.msra.mxu1 %v519_v4  ;;  %v529_v16 = vld [vmem:[%s677_s0 + $0x30] sm:$0xff]   ;;  %v531_v18 = vld [vmem:[%s677_s0 + $0x38] sm:$0xff]   ;;  %v538_v20 = vld [vmem:[%s677_s0 + $0x80] sm:$0xff]  }
   0x8   :  { %444 = vmatprep.subr.bf16.mxu0 %v520_v5  ;;  %500 = vmatprep.subr.bf16.mxu1 %v520_v5  ;;  %v532_v21 = vld [vmem:[%s678_s1] ss:$12 sps:$4 sm:$0xff]   ;;  %v540_v24 = vld [vmem:[%s678_s1 + $0x1c] ss:$12 sps:$4 sm:$0xff]   ;;  %v543_v27 = vld [vmem:[%s678_s1 + $0x18] ss:$12 sps:$4 sm:$0xff]  }
   0x9   :  { %388 = vperm.xlu0 %515, %v384_v19   ;;  %v385_v23 = vld [vmem:[%s679_s2 + $0x8] sm:$0xff]  ;;  %v545_v29 = vld [vmem:[%s678_s1 + $0x34] ss:$12 sps:$4 sm:$0xff]   ;;  %v547_v30 = vld [vmem:[%s678_s1 + $0x38] ss:$12 sps:$4 sm:$0xff]  }
   0xa   :  { %v539_v25 = vld [vmem:[%s677_s0 + $0x88] sm:$0xff]   ;;  %v548_v31 = vld [vmem:[%s678_s1 + $0x30] ss:$12 sps:$4 sm:$0xff]  }
   0xb   :  { %445 = vmatpush3.bf16.msra.mxu0 %v521_v6  ;;  %508 = vmatpush3.bf16.msra.mxu1 %v521_v6  ;;  %v542_v26 = vld [vmem:[%s678_s1 + $0x8] ss:$12 sps:$4 sm:$0xff]   ;;  %v544_v28 = vld [vmem:[%s678_s1 + $0x20] ss:$12 sps:$4 sm:$0xff]   ;;  %v549_v32 = vld [vmem:[%s678_s1 + $0x50] ss:$12 sps:$4 sm:$0xff]  }
   0xc   :  { %446 = vmatprep.subr.bf16.mxu0 %v522_v7  ;;  %501 = vmatprep.subr.bf16.mxu1 %v522_v7 }
   0xd   :  { %393 = vperm.xlu0 %515, %v385_v23  }
   0xf   :  { %447 = vmatpush3.bf16.msra.mxu0 %v523_v8  ;;  %509 = vmatpush3.bf16.msra.mxu1 %v523_v8 }
  0x10   :  { %448 = vmatprep.subr.bf16.mxu0 %v524_v9  ;;  %502 = vmatprep.subr.bf16.mxu1 %v524_v9 }
  0x13   :  { %449 = vmatpush3.bf16.msra.mxu0 %v525_v10  ;;  %510 = vmatpush3.bf16.msra.mxu1 %v525_v10 }
  0x14   :  { %450 = vmatprep.subr.bf16.mxu0 %v526_v11  ;;  %503 = vmatprep.subr.bf16.mxu1 %v526_v11 }
  0x17   :  { %451 = vmatpush3.bf16.msra.mxu0 %v527_v14  ;;  %511 = vmatpush3.bf16.msra.mxu1 %v527_v14 }
  0x18   :  { %452 = vmatprep.subr.bf16.mxu0 %v528_v15  ;;  %504 = vmatprep.subr.bf16.mxu1 %v528_v15 }
  0x1b   :  { %453 = vmatpush3.bf16.msra.mxu0 %v529_v16  ;;  %512 = vmatpush3.bf16.msra.mxu1 %v529_v16 }
  0x1c   :  { %454 = vmatprep.subr.bf16.mxu0 %v530_v17  ;;  %505 = vmatprep.subr.bf16.mxu1 %v530_v17 }
  0x1f   :  { %455 = vmatpush3.bf16.msra.mxu0 %v531_v18  ;;  %513 = vmatpush3.bf16.msra.mxu1 %v531_v18 }
  0x20   :  { %486 = vmatprep.subr.bf16.mxu1 %v538_v20 }
  0x22   :  { %281 = vmatmul.mubr.bf16.vlgmr.msra.gmra.mrb[0].mxu0 %v532_v21  ;;  %305 = vmatmul.mubr.bf16.vlgmr.msra.gmra.mrb[0].mxu1 %v535_v22 }
  0x23   :  { %487 = vmatpush3.bf16.msra.mxu1 %v538_v20  ;;  %288 = vmatprep.mubr.bf16.mxu0 %v540_v24 }
  0x24   :  { %488 = vmatprep.subr.bf16.mxu1 %v539_v25  ;;  %490 = vmatprep.mubr.msk.bf16.mxu1 %vm235_vm0, %v542_v26 }
  0x27   :  { %489 = vmatpush3.bf16.msra.mxu1 %v539_v25 }
  0x2a   :  { %289 = vmatmul.mubr.bf16.gmra.mrb[4].mxu0 %v543_v27  ;;  %491 = vmatmul.mubr.msk.bf16.vlgmr.msra.gmra.mrb[4].mxu1 %vm235_vm0, %v544_v28 }
  0x2b   :  { %296 = vmatprep.mubr.bf16.mxu0 %v545_v29  ;;  %494 = vmatprep.mubr.msk.bf16.mxu1 %vm235_vm0, %v547_v30 }
  0x32   :  { %297 = vmatmul.mubr.bf16.gmra.mrb[8].mxu0 %v548_v31  ;;  %495 = vmatmul.mubr.msk.bf16.gmra.mrb[8].mxu1 %vm235_vm0, %v549_v32 }
  0x88   :  { %v389_v10 = vpop.permute.xlu0 %388 }
  0x8c   :  { %v394_v17 = vpop.permute.xlu0 %393 }
  0xf5   :  { %v456_v33 = vpop.f32.mrb[0].mxu0  ;;  %v474_v34 = vpop.f32.mrb[0].mxu1 }
  0xf6   :  { %v457_v35 = vpop.f32.mrb[1].mxu0  ;;  %v475_v36 = vpop.f32.mrb[1].mxu1 }
  0xf7   :  { %v458_v37 = vadd.f32 %v457_v35, %v456_v33  ;;  %v476_v38 = vadd.f32 %v475_v36, %v474_v34  ;;  %v459_v39 = vpop.f32.mrb[2].mxu0  ;;  %v477_v40 = vpop.f32.mrb[2].mxu1 }
  0xf8   :  { %v460_v41 = vpop.f32.mrb[3].mxu0  ;;  %v478_v42 = vpop.f32.mrb[3].mxu1 }
  0xf9   :  { %v461_v43 = vadd.f32 %v460_v41, %v459_v39  ;;  %v479_v44 = vadd.f32 %v478_v42, %v477_v40 }
  0xfd   :  { %v462_v45 = vpop.f32.mrb[4].mxu0  ;;  %v492_v46 = vpop.f32.mrb[4].mxu1 }
  0xfe   :  { %v463_v47 = vpop.f32.mrb[5].mxu0  ;;  %v347_v48 = vpop.f32.mrb[5].mxu1 }
  0xff   :  { %v464_v49 = vadd.f32 %v463_v47, %v462_v45  ;;  %v348_v50 = vadd.f32 %v458_v37, %v347_v48  ;;  %v465_v51 = vpop.f32.mrb[6].mxu0  ;;  %v493_v52 = vpop.f32.mrb[6].mxu1 }
 0x100   :  { %v466_v53 = vpop.f32.mrb[7].mxu0  ;;  %v350_v54 = vpop.f32.mrb[7].mxu1 }
 0x101   :  { %v356_v55 = vadd.f32 %v492_v46, %v464_v49  ;;  %v467_v56 = vadd.f32 %v466_v53, %v465_v51  ;;  %v351_v57 = vadd.f32 %v461_v43, %v350_v54 }
 0x103   :  { %v378_v58 = vmax.f32 %v348_v50, %v356_v55  ;;  %v359_v59 = vadd.f32 %v493_v52, %v467_v56 }
 0x105   :  { %v379_v60 = vmax.f32 %v351_v57, %v359_v59  ;;  %v468_v61 = vpop.f32.mrb[8].mxu0  ;;  %v496_v62 = vpop.f32.mrb[8].mxu1 }
 0x106   :  { %v372_v63 = vadd.f32 %v496_v62, %v476_v38  ;;  %v469_v0 = vpop.f32.mrb[9].mxu0  ;;  %v363_v1 = vpop.f32.mrb[9].mxu1 }
 0x107   :  { %v470_v2 = vadd.f32 %v469_v0, %v468_v61  ;;  %v471_v3 = vpop.f32.mrb[10].mxu0  ;;  %v497_v4 = vpop.f32.mrb[10].mxu1 }
 0x108   :  { %v375_v5 = vadd.f32 %v497_v4, %v479_v44  ;;  %v472_v6 = vpop.f32.mrb[11].mxu0  ;;  %v366_v7 = vpop.f32.mrb[11].mxu1 }
 0x109   :  { %v364_v8 = vadd.f32 %v470_v2, %v363_v1  ;;  %v473_v9 = vadd.f32 %v472_v6, %v471_v3 }
 0x10b   :  { %v380_v11 = vmax.f32 %v378_v58, %v364_v8  ;;  %v367_v12 = vadd.f32 %v473_v9, %v366_v7 }
 0x10d   :  { %v382_v13 = vmax.f32 %v380_v11, %v372_v63  ;;  %v381_v14 = vmax.f32 %v379_v60, %v367_v12 }
 0x10f   :  { %v396_v15 = vadd.f32 %v389_v10, %v382_v13  ;;  %v383_v16 = vmax.f32 %v381_v14, %v375_v5 }
 0x111   :  { %v398_v18 = vmax.f32 %v396_v15, 0.0  ;;  %v397_v19 = vadd.f32 %v394_v17, %v383_v16 }
 0x113   :  { %400 = vst [vmem:[%s680_s3] sm:$0xff] %v398_v18  ;;  %v399_v20 = vmax.f32 %v397_v19, 0.0 }
 0x115   :  { %401 = vst [vmem:[%s680_s3 + $0x8] sm:$0xff] %v399_v20 }

// kernel: cnn_forward.5
= control target key start
LH: loop header
LB: loop body
LE: loop exit
PB: predicated region body
PF: predicated region fallthrough
CT: control target
= control target key end

     0   :  { %v680_v3 = vmov 0   ;;  %vm138_vm0 = vcmask 130048   ;;  %s1051_s0 = inlined_call_operand.vmem [shape: f32[784,128], index: 0, kind: input, shape index: {}]   ;;  %s1052_s1 = inlined_call_operand.vmem [shape: f32[10,784], index: 1, kind: input, shape index: {}]   ;;  %s1053_s2 = inlined_call_operand.vmem [shape: f32[10,1], index: 2, kind: input, shape index: {}]   ;;  %s1054_s3 = inlined_call_operand.vmem [shape: f32[10,128], index: 3, kind: output, shape index: {}]  }
   0x1   :  { %v44_v0 = vld [vmem:[%s1051_s0 + $0x80] sm:$0xff]  ;;  %v45_v1 = vld [vmem:[%s1051_s0 + $0x88] sm:$0xff]  ;;  %679 = vset.pattern.permute.xlu0 %v680_v3  ;;  %v46_v12 = vld [vmem:[%s1051_s0 + $0x90] sm:$0xff] }
   0x2   :  { %v28_v2 = vld [vmem:[%s1051_s0] sm:$0xff]  ;;  %v578_v4 = vpack.c.bf16 %v45_v1, %v44_v0  ;;  %v29_v5 = vld [vmem:[%s1051_s0 + $0x8] sm:$0xff]  ;;  %v47_v14 = vld [vmem:[%s1051_s0 + $0x98] sm:$0xff] }
   0x3   :  { %v76_v6 = vld [vmem:[%s1051_s0 + $0x180] sm:$0xff]  ;;  %v77_v7 = vld [vmem:[%s1051_s0 + $0x188] sm:$0xff]  ;;  %v580_v8 = vpack.c.bf16 %v29_v5, %v28_v2  ;;  %v30_v15 = vld [vmem:[%s1051_s0 + $0x10] sm:$0xff]  ;;  %v582_v17 = vpack.c.bf16 %v47_v14, %v46_v12 }
   0x4   :  { %v610_v9 = vpack.c.bf16 %v77_v7, %v76_v6  ;;  %v60_v10 = vld [vmem:[%s1051_s0 + $0x100] sm:$0xff]  ;;  %v61_v11 = vld [vmem:[%s1051_s0 + $0x108] sm:$0xff]  ;;  %579 = vmatprep.subr.bf16.mxu0 %v578_v4  ;;  %v31_v16 = vld [vmem:[%s1051_s0 + $0x18] sm:$0xff] }
   0x5   :  { %v612_v13 = vpack.c.bf16 %v61_v11, %v60_v10  ;;  %581 = vmatpush3.bf16.msra.mxu0 %v580_v8  ;;  %v584_v18 = vpack.c.bf16 %v31_v16, %v30_v15  ;;  %v78_v19 = vld [vmem:[%s1051_s0 + $0x190] sm:$0xff]  ;;  %v79_v20 = vld [vmem:[%s1051_s0 + $0x198] sm:$0xff]  ;;  %v48_v24 = vld [vmem:[%s1051_s0 + $0xa0] sm:$0xff] }
   0x6   :  { %611 = vmatprep.subr.bf16.mxu1 %v610_v9  ;;  %v62_v21 = vld [vmem:[%s1051_s0 + $0x110] sm:$0xff]  ;;  %v614_v22 = vpack.c.bf16 %v79_v20, %v78_v19  ;;  %v63_v23 = vld [vmem:[%s1051_s0 + $0x118] sm:$0xff]  ;;  %v49_v25 = vld [vmem:[%s1051_s0 + $0xa8] sm:$0xff]  ;;  %583 = vmatprep.subr.bf16.mxu0 %v582_v17 }
   0x7   :  { %613 = vmatpush3.bf16.msra.mxu1 %v612_v13  ;;  %v616_v26 = vpack.c.bf16 %v63_v23, %v62_v21  ;;  %v586_v27 = vpack.c.bf16 %v49_v25, %v48_v24  ;;  %v32_v28 = vld [vmem:[%s1051_s0 + $0x20] sm:$0xff]  ;;  %v33_v29 = vld [vmem:[%s1051_s0 + $0x28] sm:$0xff]  ;;  %v50_v36 = vld [vmem:[%s1051_s0 + $0xb0] sm:$0xff] }
   0x8   :  { %v80_v30 = vld [vmem:[%s1051_s0 + $0x1a0] sm:$0xff]  ;;  %615 = vmatprep.subr.bf16.mxu1 %v614_v22  ;;  %v81_v31 = vld [vmem:[%s1051_s0 + $0x1a8] sm:$0xff]  ;;  %v588_v34 = vpack.c.bf16 %v33_v29, %v32_v28  ;;  %v51_v37 = vld [vmem:[%s1051_s0 + $0xb8] sm:$0xff] }
   0x9   :  { %v64_v32 = vld [vmem:[%s1051_s0 + $0x120] sm:$0xff]  ;;  %v65_v33 = vld [vmem:[%s1051_s0 + $0x128] sm:$0xff]  ;;  %585 = vmatpush3.bf16.msra.mxu0 %v584_v18  ;;  %v618_v35 = vpack.c.bf16 %v81_v31, %v80_v30  ;;  %v34_v38 = vld [vmem:[%s1051_s0 + $0x30] sm:$0xff]  ;;  %v590_v40 = vpack.c.bf16 %v51_v37, %v50_v36 }
   0xa   :  { %587 = vmatprep.subr.bf16.mxu0 %v586_v27  ;;  %v620_v39 = vpack.c.bf16 %v65_v33, %v64_v32  ;;  %v35_v41 = vld [vmem:[%s1051_s0 + $0x38] sm:$0xff]  ;;  %v82_v42 = vld [vmem:[%s1051_s0 + $0x1b0] sm:$0xff]  ;;  %v52_v47 = vld [vmem:[%s1051_s0 + $0xc0] sm:$0xff] }
   0xb   :  { %617 = vmatpush3.bf16.msra.mxu1 %v616_v26  ;;  %v83_v43 = vld [vmem:[%s1051_s0 + $0x1b8] sm:$0xff]  ;;  %v66_v45 = vld [vmem:[%s1051_s0 + $0x130] sm:$0xff]  ;;  %v53_v48 = vld [vmem:[%s1051_s0 + $0xc8] sm:$0xff]  ;;  %v592_v49 = vpack.c.bf16 %v35_v41, %v34_v38 }
   0xc   :  { %619 = vmatprep.subr.bf16.mxu1 %v618_v35  ;;  %v622_v44 = vpack.c.bf16 %v83_v43, %v82_v42  ;;  %v67_v46 = vld [vmem:[%s1051_s0 + $0x138] sm:$0xff]  ;;  %v84_v50 = vld [vmem:[%s1051_s0 + $0x1c0] sm:$0xff]  ;;  %v85_v51 = vld [vmem:[%s1051_s0 + $0x1c8] sm:$0xff]  ;;  %v594_v53 = vpack.c.bf16 %v53_v48, %v52_v47 }
   0xd   :  { %589 = vmatpush3.bf16.msra.mxu0 %v588_v34  ;;  %v624_v52 = vpack.c.bf16 %v67_v46, %v66_v45  ;;  %v36_v54 = vld [vmem:[%s1051_s0 + $0x40] sm:$0xff]  ;;  %v37_v55 = vld [vmem:[%s1051_s0 + $0x48] sm:$0xff]  ;;  %v626_v57 = vpack.c.bf16 %v85_v51, %v84_v50  ;;  %v54_v59 = vld [vmem:[%s1051_s0 + $0xd0] sm:$0xff] }
   0xe   :  { %591 = vmatprep.subr.bf16.mxu0 %v590_v40  ;;  %v68_v56 = vld [vmem:[%s1051_s0 + $0x140] sm:$0xff]  ;;  %v69_v58 = vld [vmem:[%s1051_s0 + $0x148] sm:$0xff]  ;;  %v55_v60 = vld [vmem:[%s1051_s0 + $0xd8] sm:$0xff]  ;;  %v596_v63 = vpack.c.bf16 %v37_v55, %v36_v54 }
   0xf   :  { %621 = vmatpush3.bf16.msra.mxu1 %v620_v39  ;;  %v86_v61 = vld [vmem:[%s1051_s0 + $0x1d0] sm:$0xff]  ;;  %v87_v62 = vld [vmem:[%s1051_s0 + $0x1d8] sm:$0xff]  ;;  %v628_v0 = vpack.c.bf16 %v69_v58, %v68_v56  ;;  %v598_v1 = vpack.c.bf16 %v55_v60, %v54_v59  ;;  %v56_v7 = vld [vmem:[%s1051_s0 + $0xe0] sm:$0xff] }
  0x10   :  { %623 = vmatprep.subr.bf16.mxu1 %v622_v44  ;;  %v38_v2 = vld [vmem:[%s1051_s0 + $0x50] sm:$0xff]  ;;  %v39_v3 = vld [vmem:[%s1051_s0 + $0x58] sm:$0xff]  ;;  %v630_v5 = vpack.c.bf16 %v87_v62, %v86_v61  ;;  %v57_v8 = vld [vmem:[%s1051_s0 + $0xe8] sm:$0xff] }
  0x11   :  { %593 = vmatpush3.bf16.msra.mxu0 %v592_v49  ;;  %v70_v4 = vld [vmem:[%s1051_s0 + $0x150] sm:$0xff]  ;;  %v71_v6 = vld [vmem:[%s1051_s0 + $0x158] sm:$0xff]  ;;  %v88_v9 = vld [vmem:[%s1051_s0 + $0x1e0] sm:$0xff]  ;;  %v600_v11 = vpack.c.bf16 %v39_v3, %v38_v2  ;;  %v602_v15 = vpack.c.bf16 %v57_v8, %v56_v7 }
  0x12   :  { %595 = vmatprep.subr.bf16.mxu0 %v594_v53  ;;  %v89_v10 = vld [vmem:[%s1051_s0 + $0x1e8] sm:$0xff]  ;;  %v40_v12 = vld [vmem:[%s1051_s0 + $0x60] sm:$0xff]  ;;  %v632_v14 = vpack.c.bf16 %v71_v6, %v70_v4  ;;  %v58_v20 = vld [vmem:[%s1051_s0 + $0xf0] sm:$0xff] }
  0x13   :  { %625 = vmatpush3.bf16.msra.mxu1 %v624_v52  ;;  %v15_v13 = vld [vmem:[%s1052_s1 + $0x8] sm:$0xff]  ;;  %v72_v17 = vld [vmem:[%s1051_s0 + $0x160] sm:$0xff]  ;;  %v634_v19 = vpack.c.bf16 %v89_v10, %v88_v9  ;;  %v59_v21 = vld [vmem:[%s1051_s0 + $0xf8] sm:$0xff] }
  0x14   :  { %627 = vmatprep.subr.bf16.mxu1 %v626_v57  ;;  %v41_v16 = vld [vmem:[%s1051_s0 + $0x68] sm:$0xff]  ;;  %209 = vmatprep.mubr.f32.mxu0 %v15_v13  ;;  %v17_v22 = vld [vmem:[%s1052_s1 + $0x18] sm:$0xff]  ;;  %v90_v23 = vld [vmem:[%s1051_s0 + $0x1f0] sm:$0xff]  ;;  %v606_v27 = vpack.c.bf16 %v59_v21, %v58_v20 }
  0x15   :  { %597 = vmatpush3.bf16.msra.mxu0 %v596_v63  ;;  %v73_v18 = vld [vmem:[%s1051_s0 + $0x168] sm:$0xff]  ;;  %v91_v24 = vld [vmem:[%s1051_s0 + $0x1f8] sm:$0xff]  ;;  %284 = vmatprep.mubr.f32.mxu1 %v17_v22  ;;  %v604_v25 = vpack.c.bf16 %v41_v16, %v40_v12  ;;  %v42_v28 = vld [vmem:[%s1051_s0 + $0x70] sm:$0xff] }
  0x16   :  { %599 = vmatprep.subr.bf16.mxu0 %v598_v1  ;;  %v636_v26 = vpack.c.bf16 %v73_v18, %v72_v17  ;;  %v43_v29 = vld [vmem:[%s1051_s0 + $0x78] sm:$0xff]  ;;  %v74_v30 = vld [vmem:[%s1051_s0 + $0x170] sm:$0xff]  ;;  %v638_v31 = vpack.c.bf16 %v91_v24, %v90_v23  ;;  %v108_v33 = vld [vmem:[%s1051_s0 + $0x280] sm:$0xff] }
  0x17   :  { %629 = vmatpush3.bf16.msra.mxu1 %v628_v0  ;;  %v75_v32 = vld [vmem:[%s1051_s0 + $0x178] sm:$0xff]  ;;  %v109_v34 = vld [vmem:[%s1051_s0 + $0x288] sm:$0xff]  ;;  %v608_v35 = vpack.c.bf16 %v43_v29, %v42_v28  ;;  %v92_v38 = vld [vmem:[%s1051_s0 + $0x200] sm:$0xff] }
  0x18   :  { %631 = vmatprep.subr.bf16.mxu1 %v630_v5  ;;  %v640_v36 = vpack.c.bf16 %v75_v32, %v74_v30  ;;  %v642_v37 = vpack.c.bf16 %v109_v34, %v108_v33  ;;  %v93_v39 = vld [vmem:[%s1051_s0 + $0x208] sm:$0xff]  ;;  %v110_v40 = vld [vmem:[%s1051_s0 + $0x290] sm:$0xff]  ;;  %v111_v41 = vld [vmem:[%s1051_s0 + $0x298] sm:$0xff] }
  0x19   :  { %601 = vmatpush3.bf16.msra.mxu0 %v600_v11  ;;  %v14_v42 = vld [vmem:[%s1052_s1] sm:$0xff]  ;;  %v644_v43 = vpack.c.bf16 %v93_v39, %v92_v38  ;;  %v16_v44 = vld [vmem:[%s1052_s1 + $0x10] sm:$0xff]  ;;  %v646_v45 = vpack.c.bf16 %v111_v41, %v110_v40  ;;  %v95_v47 = vld [vmem:[%s1051_s0 + $0x218] sm:$0xff] }
  0x1a   :  { %603 = vmatprep.subr.bf16.mxu0 %v602_v15  ;;  %v94_v46 = vld [vmem:[%s1051_s0 + $0x210] sm:$0xff]  ;;  %v112_v48 = vld [vmem:[%s1051_s0 + $0x2a0] sm:$0xff]  ;;  %v113_v49 = vld [vmem:[%s1051_s0 + $0x2a8] sm:$0xff] }
  0x1b   :  { %633 = vmatpush3.bf16.msra.mxu1 %v632_v14  ;;  %v22_v50 = vld [vmem:[%s1052_s1 + $0x40] sm:$0x3]  ;;  %v24_v51 = vld [vmem:[%s1052_s1 + $0x50] sm:$0x3]  ;;  %v125_v53 = vld [vmem:[%s1051_s0 + $0x308] sm:$0xff]  ;;  %v648_v54 = vpack.c.bf16 %v95_v47, %v94_v46  ;;  %v650_v57 = vpack.c.bf16 %v113_v49, %v112_v48 }
  0x1c   :  { %635 = vmatprep.subr.bf16.mxu1 %v634_v19  ;;  %v124_v52 = vld [vmem:[%s1051_s0 + $0x300] sm:$0xff]  ;;  %v21_v55 = vld [vmem:[%s1052_s1 + $0x38] sm:$0x3]  ;;  %v97_v59 = vld [vmem:[%s1051_s0 + $0x228] sm:$0xff] }
  0x1d   :  { %605 = vmatpush3.bf16.msra.mxu0 %v604_v25  ;;  %v674_v56 = vpack.c.bf16 %v125_v53, %v124_v52  ;;  %v96_v58 = vld [vmem:[%s1051_s0 + $0x220] sm:$0xff]  ;;  %v23_v60 = vld [vmem:[%s1052_s1 + $0x48] sm:$0x3]  ;;  %v114_v61 = vld [vmem:[%s1051_s0 + $0x2b0] sm:$0xff] }
  0x1e   :  { %607 = vmatprep.subr.bf16.mxu0 %v606_v27  ;;  %v115_v62 = vld [vmem:[%s1051_s0 + $0x2b8] sm:$0xff]  ;;  %v19_v63 = vld [vmem:[%s1052_s1 + $0x28] sm:$0xff]  ;;  %v20_v0 = vld [vmem:[%s1052_s1 + $0x30] sm:$0xff]  ;;  %v652_v2 = vpack.c.bf16 %v97_v59, %v96_v58 }
  0x1f   :  { %637 = vmatpush3.bf16.msra.mxu1 %v636_v26  ;;  %v126_v1 = vld [vmem:[%s1053_s2] sm:$0xff]  ;;  %v654_v3 = vpack.c.bf16 %v115_v62, %v114_v61  ;;  %v98_v4 = vld [vmem:[%s1051_s0 + $0x230] sm:$0xff]  ;;  %v99_v5 = vld [vmem:[%s1051_s0 + $0x238] sm:$0xff] }
  0x20   :  { %639 = vmatprep.subr.bf16.mxu1 %v638_v31  ;;  %v27_v6 = vld [vmem:[%s1052_s1 + $0x68] sm:$0x3]  ;;  %v116_v7 = vld [vmem:[%s1051_s0 + $0x2c0] sm:$0xff]  ;;  %130 = vperm.xlu0 %679, %v126_v1   ;;  %v656_v10 = vpack.c.bf16 %v99_v5, %v98_v4  ;;  %v118_v14 = vld [vmem:[%s1051_s0 + $0x2d0] sm:$0xff] }
  0x21   :  { %609 = vmatpush3.bf16.msra.mxu0 %v608_v35  ;;  %v117_v8 = vld [vmem:[%s1051_s0 + $0x2c8] sm:$0xff]  ;;  %v100_v12 = vld [vmem:[%s1051_s0 + $0x240] sm:$0xff]  ;;  %v119_v15 = vld [vmem:[%s1051_s0 + $0x2d8] sm:$0xff] }
  0x22   :  { %643 = vmatprep.subr.bf16.mxu0 %v642_v37  ;;  %v127_v9 = vld [vmem:[%s1053_s2 + $0x8] sm:$0x3]  ;;  %v658_v11 = vpack.c.bf16 %v117_v8, %v116_v7  ;;  %v662_v17 = vpack.c.bf16 %v119_v15, %v118_v14  ;;  %v102_v18 = vld [vmem:[%s1051_s0 + $0x250] sm:$0xff]  ;;  %v103_v19 = vld [vmem:[%s1051_s0 + $0x258] sm:$0xff] }
  0x23   :  { %641 = vmatpush3.bf16.msra.mxu1 %v640_v36  ;;  %v101_v13 = vld [vmem:[%s1051_s0 + $0x248] sm:$0xff]  ;;  %v120_v20 = vld [vmem:[%s1051_s0 + $0x2e0] sm:$0xff]  ;;  %v664_v22 = vpack.c.bf16 %v103_v19, %v102_v18  ;;  %v122_v26 = vld [vmem:[%s1051_s0 + $0x2f0] sm:$0xff] }
  0x24   :  { %210 = vmatmul.mubr.f32.vlgmr.msra.gmra.mrb[0].mxu0 %v14_v42  ;;  %675 = vmatprep.subr.bf16.mxu1 %v674_v56  ;;  %v660_v16 = vpack.c.bf16 %v101_v13, %v100_v12  ;;  %v121_v21 = vld [vmem:[%s1051_s0 + $0x2e8] sm:$0xff]  ;;  %v104_v24 = vld [vmem:[%s1051_s0 + $0x260] sm:$0xff]  ;;  %v123_v27 = vld [vmem:[%s1051_s0 + $0x2f8] sm:$0xff] }
  0x25   :  { %645 = vmatpush3.bf16.msra.mxu0 %v644_v43  ;;  %214 = vmatprep.mubr.f32.mxu0 %v22_v50  ;;  %v666_v23 = vpack.c.bf16 %v121_v21, %v120_v20  ;;  %v105_v25 = vld [vmem:[%s1051_s0 + $0x268] sm:$0xff]  ;;  %v670_v29 = vpack.c.bf16 %v123_v27, %v122_v26  ;;  %v106_v30 = vld [vmem:[%s1051_s0 + $0x270] sm:$0xff]  ;;  %v107_v31 = vld [vmem:[%s1051_s0 + $0x278] sm:$0xff] }
  0x26   :  { %285 = vmatmul.mubr.f32.vlgmr.msra.gmra.mrb[0].mxu1 %v16_v44  ;;  %647 = vmatprep.subr.bf16.mxu0 %v646_v45  ;;  %v668_v28 = vpack.c.bf16 %v105_v25, %v104_v24  ;;  %v672_v32 = vpack.c.bf16 %v107_v31, %v106_v30  ;;  %v18_v33 = vld [vmem:[%s1052_s1 + $0x20] sm:$0xff]  ;;  %v25_v35 = vld [vmem:[%s1052_s1 + $0x58] sm:$0x3] }
  0x27   :  { %289 = vmatprep.mubr.f32.mxu1 %v24_v51  ;;  %677 = vmatpush3.bf16.msra.mxu1 %v674_v56  ;;  %v26_v34 = vld [vmem:[%s1052_s1 + $0x60] sm:$0x3] }
  0x28   :  { %215 = vmatmul.mubr.f32.gmra.mrb[2].mxu0 %v21_v55  ;;  %135 = vperm.xlu0 %679, %v127_v9  }
  0x29   :  { %649 = vmatpush3.bf16.msra.mxu0 %v648_v54  ;;  %359 = vmatprep.mubr.f32.mxu0 %v19_v63 }
  0x2a   :  { %290 = vmatmul.mubr.f32.gmra.mrb[2].mxu1 %v23_v60  ;;  %651 = vmatprep.subr.bf16.mxu0 %v650_v57 }
  0x2b   :  { %575 = vmatprep.mubr.msk.f32.mxu1 %vm138_vm0, %v20_v0 }
  0x2d   :  { %653 = vmatpush3.bf16.msra.mxu0 %v652_v2 }
  0x2e   :  { %576 = vmatmul.mubr.msk.f32.vlgmr.msra.gmra.mrb[4].mxu1 %vm138_vm0, %v27_v6  ;;  %655 = vmatprep.subr.bf16.mxu0 %v654_v3 }
  0x31   :  { %657 = vmatpush3.bf16.msra.mxu0 %v656_v10 }
  0x32   :  { %659 = vmatprep.subr.bf16.mxu0 %v658_v11 }
  0x35   :  { %661 = vmatpush3.bf16.msra.mxu0 %v660_v16 }
  0x36   :  { %663 = vmatprep.subr.bf16.mxu0 %v662_v17 }
  0x39   :  { %665 = vmatpush3.bf16.msra.mxu0 %v664_v22 }
  0x3a   :  { %667 = vmatprep.subr.bf16.mxu0 %v666_v23 }
  0x3d   :  { %669 = vmatpush3.bf16.msra.mxu0 %v668_v28 }
  0x3e   :  { %671 = vmatprep.subr.bf16.mxu0 %v670_v29 }
  0x41   :  { %673 = vmatpush3.bf16.msra.mxu0 %v672_v32 }
  0x44   :  { %360 = vmatmul.mubr.f32.vlgmr.msra.gmra.mrb[4].mxu0 %v18_v33 }
  0x45   :  { %364 = vmatprep.mubr.f32.mxu0 %v26_v34 }
  0x48   :  { %365 = vmatmul.mubr.f32.gmra.mrb[6].mxu0 %v25_v35 }
  0x9f   :  { %v131_v37 = vpop.permute.xlu0 %130 }
  0xa7   :  { %v136_v45 = vpop.permute.xlu0 %135 }
  0xf7   :  { %v485_v36 = vpop.f32.mrb[0].mxu0 }
  0xf8   :  { %v486_v38 = vpop.f32.mrb[1].mxu0 }
  0xf9   :  { %v523_v39 = vpop.f32.mrb[0].mxu1  ;;  %v487_v40 = vadd.f32 %v486_v38, %v485_v36 }
  0xfa   :  { %v524_v41 = vpop.f32.mrb[1].mxu1 }
  0xfb   :  { %v525_v42 = vadd.f32 %v524_v41, %v523_v39  ;;  %v212_v43 = vadd.f32 %v487_v40, %v131_v37  ;;  %v488_v44 = vpop.f32.mrb[2].mxu0 }
  0xfc   :  { %v489_v46 = vpop.f32.mrb[3].mxu0 }
  0xfd   :  { %v526_v47 = vpop.f32.mrb[2].mxu1  ;;  %v287_v48 = vadd.f32 %v525_v42, %v212_v43  ;;  %v490_v49 = vadd.f32 %v489_v46, %v488_v44 }
  0xfe   :  { %v527_v50 = vpop.f32.mrb[3].mxu1 }
  0xff   :  { %v528_v51 = vadd.f32 %v527_v50, %v526_v47  ;;  %v217_v52 = vadd.f32 %v490_v49, %v136_v45 }
 0x101   :  { %v577_v53 = vpop.f32.mrb[4].mxu1  ;;  %v292_v54 = vadd.f32 %v528_v51, %v217_v52 }
 0x102   :  { %v436_v55 = vpop.f32.mrb[5].mxu1 }
 0x117   :  { %v561_v56 = vpop.f32.mrb[4].mxu0 }
 0x118   :  { %v562_v57 = vpop.f32.mrb[5].mxu0 }
 0x119   :  { %v563_v58 = vadd.f32 %v562_v57, %v561_v56 }
 0x11b   :  { %v564_v59 = vpop.f32.mrb[6].mxu0  ;;  %v362_v60 = vadd.f32 %v563_v58, %v287_v48 }
 0x11c   :  { %v565_v61 = vpop.f32.mrb[7].mxu0 }
 0x11d   :  { %v566_v62 = vadd.f32 %v565_v61, %v564_v59  ;;  %v437_v63 = vadd.f32 %v436_v55, %v362_v60 }
 0x11f   :  { %v367_v0 = vadd.f32 %v566_v62, %v292_v54  ;;  %445 = vst [vmem:[%s1054_s3] sm:$0xff] %v437_v63 }
 0x121   :  { %v442_v1 = vadd.f32 %v577_v53, %v367_v0 }
 0x123   :  { %446 = vst [vmem:[%s1054_s3 + $0x8] sm:$0x3] %v442_v1 }

</bundles_post_ra>
